<compile_context>
chip_gen: v7x
topology: tpu7x:2x2x1
jax: 0.10.0
libtpu: 0.0.40
codegen_flags: <defaults>
</compile_context>

<pallas_src>
import string

import jax
import jax.numpy as jnp
from jax.experimental import pallas as pl
from jax.experimental.pallas import tpu as pltpu

_NEG_INF = -1e30


def _lstm_batch_kernel(maxlen_ref,                     # SMEM (1,)   int32 (scalar prefetch)
                       x_ref,                          # VMEM (S_pad, B_blk, 4H) f32
                       len_ref,                        # VMEM (B_blk, 1) int32
                       whh_ref,                        # VMEM (H, 4H) bf16
                       b_ref,                          # VMEM (1, 4H) f32
                       who_ref,                        # VMEM (H, Opad) f32
                       bo_ref,                         # VMEM (1, Opad) f32
                       out_ref):                       # VMEM (B_blk, Opad) f32
    H = whh_ref.shape[0]
    B_blk = out_ref.shape[0]
    n_steps = maxlen_ref[0]                            # dynamic trip count

    lens = len_ref[...]                                # (B_blk, 1) int32
    whh = whh_ref[...]                                 # resident bf16 recurrent weights
    bias = b_ref[...]                                  # (1, 4H) f32

    def step(t, carry):
        h, c = carry                                   # (B_blk, H) f32, vreg-carried
        x_row = x_ref[t]                               # (B_blk, 4H) f32 pre-gathered rows
        gates = (x_row
                 + jnp.dot(h.astype(jnp.bfloat16), whh,
                           preferred_element_type=jnp.float32)
                 + bias)                               # (B_blk, 4H) f32
        # PyTorch gate order: i, f, g, o — all elementwise math in f32.
        i_g = jax.nn.sigmoid(gates[:, 0 * H:1 * H])
        f_g = jax.nn.sigmoid(gates[:, 1 * H:2 * H])
        g_g = jnp.tanh(gates[:, 2 * H:3 * H])
        o_g = jax.nn.sigmoid(gates[:, 3 * H:4 * H])
        c_new = f_g * c + i_g * g_g
        h_new = o_g * jnp.tanh(c_new)
        active = t < lens                              # per-name length mask (B_blk, 1)
        return (jnp.where(active, h_new, h),
                jnp.where(active, c_new, c))

    h0 = jnp.zeros((B_blk, H), jnp.float32)
    c0 = jnp.zeros((B_blk, H), jnp.float32)
    h, _ = jax.lax.fori_loop(0, n_steps, step, (h0, c0))

    # h2o Linear + LogSoftmax once, after the recurrence (intermediate outputs
    # are never used by the reference inference loop).
    logits = jnp.dot(h, who_ref[...],
                     preferred_element_type=jnp.float32) + bo_ref[...]
    m = jnp.max(logits, axis=-1, keepdims=True)
    shifted = logits - m
    lse = jnp.log(jnp.sum(jnp.exp(shifted), axis=-1, keepdims=True))
    out_ref[...] = shifted - lse


def lstm_net_infer_batch(packed_params, letter_idx, lengths, *, block_b=8):
    """Runs a padded batch of names through the LSTM in one fused kernel.

    letter_idx: (B, S_pad) int32 padded letter indices (B % block_b == 0).
    lengths:    (B,) int32 true lengths (0 for padding rows).
    Returns padded log-probs (B, Opad).
    """
    w_ihT, w_hhT, b, w_hoT, b_o = packed_params
    B, S_pad = letter_idx.shape
    H, G = w_hhT.shape                                 # G = 4H
    Opad = b_o.shape[-1]
    assert B % block_b == 0, "batch must be padded to a multiple of block_b"

    # Input is one-hot => x_t @ W_ih^T is a row gather; do it once in XLA.
    x_rows = jnp.take(w_ihT, letter_idx, axis=0)       # (B, S_pad, 4H) f32
    x_rows = jnp.transpose(x_rows, (1, 0, 2))          # (S_pad, B, 4H)

    lens2d = lengths.astype(jnp.int32)[:, None]        # (B, 1)
    max_len = jnp.max(lengths).astype(jnp.int32)[None]  # (1,) scalar prefetch

    grid = (B // block_b,)
    out = pl.pallas_call(
        _lstm_batch_kernel,
        out_shape=jax.ShapeDtypeStruct((B, Opad), jnp.float32),
        grid_spec=pltpu.PrefetchScalarGridSpec(
            num_scalar_prefetch=1,
            grid=grid,
            in_specs=[
                pl.BlockSpec((S_pad, block_b, G), lambda g, ml: (0, g, 0)),  # x rows
                pl.BlockSpec((block_b, 1), lambda g, ml: (g, 0)),            # lengths
                pl.BlockSpec((H, G), lambda g, ml: (0, 0)),                  # W_hh^T (bf16)
                pl.BlockSpec((1, G), lambda g, ml: (0, 0)),                  # b_ih + b_hh
                pl.BlockSpec((H, Opad), lambda g, ml: (0, 0)),               # W_ho^T (padded)
                pl.BlockSpec((1, Opad), lambda g, ml: (0, 0)),               # b_ho   (padded)
            ],
            out_specs=pl.BlockSpec((block_b, Opad), lambda g, ml: (g, 0)),   # log-probs
        ),
        compiler_params=pltpu.CompilerParams(
            dimension_semantics=("parallel",)),        # batch blocks -> 2nd TC on v7x
    )(max_len, x_rows, lens2d, w_hhT, b, w_hoT, b_o)
    return out


# ----------------------------------------------------------------------------
# Parameter handling (PyTorch-shaped -> kernel layout)
# ----------------------------------------------------------------------------
def init_raw_params(key, input_size, hidden_size, output_size):
    """Deterministic synthetic parameters in PyTorch nn.LSTM / nn.Linear shapes."""
    ks = jax.random.split(key, 6)
    scale = 1.0 / jnp.sqrt(hidden_size)
    w_ih = jax.random.uniform(ks[0], (4 * hidden_size, input_size),
                              jnp.float32, -scale, scale)
    w_hh = jax.random.uniform(ks[1], (4 * hidden_size, hidden_size),
                              jnp.float32, -scale, scale)
    b_ih = jax.random.uniform(ks[2], (4 * hidden_size,), jnp.float32, -scale, scale)
    b_hh = jax.random.uniform(ks[3], (4 * hidden_size,), jnp.float32, -scale, scale)
    w_ho = jax.random.uniform(ks[4], (output_size, hidden_size),
                              jnp.float32, -scale, scale)
    b_ho = jax.random.uniform(ks[5], (output_size,), jnp.float32, -scale, scale)
    return w_ih, w_hh, b_ih, b_hh, w_ho, b_ho


def pack_params(raw, out_pad=128):
    """Pre-transpose / pad / cast the PyTorch-shaped weights for the kernel."""
    w_ih, w_hh, b_ih, b_hh, w_ho, b_ho = raw
    four_h, I = w_ih.shape
    H = w_hh.shape[1]
    O = w_ho.shape[0]
    out_pad = max(out_pad, ((O + 127) // 128) * 128)   # keep output lane-dense

    w_ihT = jnp.transpose(w_ih)                                    # (I, 4H) f32 (gathered in wrapper)
    w_hhT = jnp.transpose(w_hh).astype(jnp.bfloat16)               # (H, 4H) bf16 (MXU operand only)
    b = (b_ih + b_hh)[None, :]                                     # (1, 4H) f32
    w_hoT = jnp.zeros((H, out_pad), jnp.float32).at[:, :O].set(jnp.transpose(w_ho))
    b_o = jnp.full((1, out_pad), _NEG_INF, jnp.float32).at[0, :O].set(b_ho)
    return w_ihT, w_hhT, b, w_hoT, b_o


# ----------------------------------------------------------------------------
# Name handling (replaces host-side one-hot construction)
# ----------------------------------------------------------------------------
def name_to_indices(name, all_letters):
    n_letters = len(all_letters)
    idx = []
    for letter in name:
        pos = all_letters.find(letter)
        # PyTorch reference sets rep[...][-1] for unseen letters (find() -> -1).
        idx.append(pos if pos >= 0 else n_letters - 1)
    return jnp.asarray(idx, dtype=jnp.int32)


def names_to_batch(names, all_letters, *, seq_bucket=16, block_b=8):
    """Pad indices to a length bucket and the batch to a multiple of block_b,
    so one kernel compile covers all names (padding rows have length 0)."""
    n_letters = len(all_letters)
    max_len = max([len(n) for n in names] + [1])
    s_pad = ((max_len + seq_bucket - 1) // seq_bucket) * seq_bucket
    b_pad = ((len(names) + block_b - 1) // block_b) * block_b
    idx = [[0] * s_pad for _ in range(b_pad)]
    lens = [0] * b_pad
    for bi, name in enumerate(names):
        lens[bi] = len(name)
        for t, letter in enumerate(name):
            pos = all_letters.find(letter)
            idx[bi][t] = pos if pos >= 0 else n_letters - 1
    return jnp.asarray(idx, jnp.int32), jnp.asarray(lens, jnp.int32)


def infer_batch(packed_params, names, all_letters, n_languages, *, block_b=8):
    letter_idx, lengths = names_to_batch(names, all_letters, block_b=block_b)
    out_padded = lstm_net_infer_batch(packed_params, letter_idx, lengths,
                                      block_b=block_b)
    return out_padded[:len(names), :n_languages]


def infer(packed_params, name, all_letters, n_languages):
    """Single-name path, matching PyTorch infer(net, name) -> (1, n_languages)."""
    return infer_batch(packed_params, [name], all_letters, n_languages)[:1]


# ----------------------------------------------------------------------------
# Pure-JAX reference (mirrors the PyTorch forward exactly) for validation
# ----------------------------------------------------------------------------
def ref_infer(raw, letter_idx, n_letters):
    w_ih, w_hh, b_ih, b_hh, w_ho, b_ho = raw
    H = w_hh.shape[1]
    h = jnp.zeros((1, H), jnp.float32)
    c = jnp.zeros((1, H), jnp.float32)
    for t in range(letter_idx.shape[0]):
        x = jax.nn.one_hot(letter_idx[t], n_letters, dtype=jnp.float32)[None, :]
        gates = jnp.dot(x, w_ih.T) + b_ih + jnp.dot(h, w_hh.T) + b_hh
        i_g = jax.nn.sigmoid(gates[:, 0 * H:1 * H])
        f_g = jax.nn.sigmoid(gates[:, 1 * H:2 * H])
        g_g = jnp.tanh(gates[:, 2 * H:3 * H])
        o_g = jax.nn.sigmoid(gates[:, 3 * H:4 * H])
        c = f_g * c + i_g * g_g
        h = o_g * jnp.tanh(c)
    logits = jnp.dot(h, w_ho.T) + b_ho
    return jax.nn.log_softmax(logits, axis=-1)


if __name__ == "__main__":
    all_letters = string.ascii_letters + '.,;'
    n_letters = len(all_letters)          # 55
    n_hidden = 128
    n_languages = 18                      # synthetic number of output classes

    key = jax.random.PRNGKey(0)
    raw = init_raw_params(key, n_letters, n_hidden, n_languages)
    packed = pack_params(raw)

    # A small batch of names: padded internally to B=16 -> grid=(2,) "parallel"
    # batch blocks; all lengths share one compile (bucketed to S_pad=16).
    names = ['Adam', 'Jackson', 'Satoshi', 'Mueller', 'Oconnor',
             'Nguyen', 'Schmidt', 'Rossi', 'Dubois']
    log_probs = infer_batch(packed, names, all_letters, n_languages)
    log_probs = jax.block_until_ready(log_probs)

    # Shape + valid log-softmax (rows sum to ~1 in prob space).
    assert log_probs.shape == (len(names), n_languages)
    prob_sums = jnp.sum(jnp.exp(log_probs), axis=-1)
    assert float(jnp.max(jnp.abs(prob_sums - 1.0))) < 1e-3

    # Per-name agreement with the pure-JAX reference of the original module
    # (recurrent MXU operands are bf16, hence the small tolerance).
    for bi, name in enumerate(names):
        ref = ref_infer(raw, name_to_indices(name, all_letters), n_letters)
        err = float(jnp.max(jnp.abs(log_probs[bi:bi + 1] - ref)))
        assert err < 3e-2, f"{name}: mismatch vs reference: {err}"

    # Single-name path, like the PyTorch `infer(net, 'Adam')`.
    single = infer(packed, 'Adam', all_letters, n_languages)
    single = jax.block_until_ready(single)
    assert single.shape == (1, n_languages)
    ref_adam = ref_infer(raw, name_to_indices('Adam', all_letters), n_letters)
    err = float(jnp.max(jnp.abs(single - ref_adam)))
    assert err < 3e-2, f"single-name mismatch vs reference: {err}"

    print("KERNEL_OK")
</pallas_src>

<mosaic_0001>
module attributes {stable_mosaic.version = 11 : i64} {
  func.func @_lstm_batch_kernel(%arg0: i32, %arg1: memref<1xi32, #tpu.memory_space<smem>>, %arg2: memref<16x8x512xf32, #tpu.memory_space<vmem>>, %arg3: memref<8x1xi32, #tpu.memory_space<vmem>>, %arg4: memref<128x512xbf16, #tpu.memory_space<vmem>>, %arg5: memref<1x512xf32, #tpu.memory_space<vmem>>, %arg6: memref<128x128xf32, #tpu.memory_space<vmem>>, %arg7: memref<1x128xf32, #tpu.memory_space<vmem>>, %arg8: memref<8x128xf32, #tpu.memory_space<vmem>>) attributes {dimension_semantics = [#tpu.dimension_semantics<parallel>], iteration_bounds = array<i64: 2>, scalar_prefetch = 1 : i64, scratch_operands = 0 : i64, tpu.core_type = #tpu.core_type<tc>, window_params = [{transform_indices = @transform_0, window_bounds = array<i64: 16, 8, 512>}, {transform_indices = @transform_1, window_bounds = array<i64: 8, 1>}, {pipeline_mode = #tpu.pipeline_mode<synchronous>, transform_indices = @transform_2, window_bounds = array<i64: 128, 512>}, {pipeline_mode = #tpu.pipeline_mode<synchronous>, transform_indices = @transform_3, window_bounds = array<i64: 1, 512>}, {pipeline_mode = #tpu.pipeline_mode<synchronous>, transform_indices = @transform_4, window_bounds = array<i64: 128, 128>}, {pipeline_mode = #tpu.pipeline_mode<synchronous>, transform_indices = @transform_5, window_bounds = array<i64: 1, 128>}, {transform_indices = @transform_6, window_bounds = array<i64: 8, 128>}]} {
    %c0 = arith.constant 0 : index
    %0 = memref.load %arg1[%c0] : memref<1xi32, #tpu.memory_space<smem>>
    %c0_0 = arith.constant 0 : index
    %c0_1 = arith.constant 0 : index
    %1 = vector.load %arg3[%c0_0, %c0_1] : memref<8x1xi32, #tpu.memory_space<vmem>>, vector<8x1xi32>
    %c0_2 = arith.constant 0 : index
    %c0_3 = arith.constant 0 : index
    %2 = vector.load %arg4[%c0_2, %c0_3] : memref<128x512xbf16, #tpu.memory_space<vmem>>, vector<128x512xbf16>
    %c0_4 = arith.constant 0 : index
    %c0_5 = arith.constant 0 : index
    %3 = vector.load %arg5[%c0_4, %c0_5] : memref<1x512xf32, #tpu.memory_space<vmem>>, vector<1x512xf32>
    %cst = arith.constant 0.000000e+00 : f32
    %4 = vector.broadcast %cst : f32 to vector<8x128xf32>
    %cst_6 = arith.constant 0.000000e+00 : f32
    %5 = vector.broadcast %cst_6 : f32 to vector<8x128xf32>
    %c0_i32 = arith.constant 0 : i32
    %6 = arith.subi %0, %c0_i32 : i32
    %7 = arith.addi %c0_i32, %6 : i32
    %c1_i32 = arith.constant 1 : i32
    %8:2 = scf.for %arg9 = %c0_i32 to %7 step %c1_i32 iter_args(%arg10 = %4, %arg11 = %5) -> (vector<8x128xf32>, vector<8x128xf32>)  : i32 {
      %25 = arith.index_cast %arg9 : i32 to index
      %c0_16 = arith.constant 0 : index
      %c0_17 = arith.constant 0 : index
      %26 = vector.load %arg2[%25, %c0_16, %c0_17] : memref<16x8x512xf32, #tpu.memory_space<vmem>>, vector<1x8x512xf32>
      %27 = vector.shape_cast %26 : vector<1x8x512xf32> to vector<8x512xf32>
      %28 = arith.truncf %arg10 : vector<8x128xf32> to vector<8x128xbf16>
      %cst_18 = arith.constant dense<0.000000e+00> : vector<8x512xf32>
      %29 = tpu.matmul %28, %2, %cst_18 {dimension_numbers = #tpu.dot_dimension_numbers<[1], [0], [0], [1], [0, 0, 1, 1], [], []>} : vector<8x128xbf16>, vector<128x512xbf16>, vector<8x512xf32> -> vector<8x512xf32>
      %30 = arith.addf %27, %29 : vector<8x512xf32>
      %31 = vector.broadcast %3 : vector<1x512xf32> to vector<8x512xf32>
      %32 = arith.addf %30, %31 : vector<8x512xf32>
      %33 = vector.extract_strided_slice %32 {offsets = [0, 0], sizes = [8, 128], strides = [1, 1]} : vector<8x512xf32> to vector<8x128xf32>
      %34 = arith.negf %33 : vector<8x128xf32>
      %35 = math.exp %34 : vector<8x128xf32>
      %cst_19 = arith.constant 1.000000e+00 : f32
      %36 = vector.broadcast %cst_19 : f32 to vector<8x128xf32>
      %37 = arith.addf %36, %35 : vector<8x128xf32>
      %38 = arith.divf %36, %37 : vector<8x128xf32>
      %39 = vector.extract_strided_slice %32 {offsets = [0, 128], sizes = [8, 128], strides = [1, 1]} : vector<8x512xf32> to vector<8x128xf32>
      %40 = arith.negf %39 : vector<8x128xf32>
      %41 = math.exp %40 : vector<8x128xf32>
      %cst_20 = arith.constant 1.000000e+00 : f32
      %42 = vector.broadcast %cst_20 : f32 to vector<8x128xf32>
      %43 = arith.addf %42, %41 : vector<8x128xf32>
      %44 = arith.divf %42, %43 : vector<8x128xf32>
      %45 = vector.extract_strided_slice %32 {offsets = [0, 256], sizes = [8, 128], strides = [1, 1]} : vector<8x512xf32> to vector<8x128xf32>
      %46 = math.tanh %45 : vector<8x128xf32>
      %47 = vector.extract_strided_slice %32 {offsets = [0, 384], sizes = [8, 128], strides = [1, 1]} : vector<8x512xf32> to vector<8x128xf32>
      %48 = arith.negf %47 : vector<8x128xf32>
      %49 = math.exp %48 : vector<8x128xf32>
      %cst_21 = arith.constant 1.000000e+00 : f32
      %50 = vector.broadcast %cst_21 : f32 to vector<8x128xf32>
      %51 = arith.addf %50, %49 : vector<8x128xf32>
      %52 = arith.divf %50, %51 : vector<8x128xf32>
      %53 = arith.mulf %44, %arg11 : vector<8x128xf32>
      %54 = arith.mulf %38, %46 : vector<8x128xf32>
      %55 = arith.addf %53, %54 : vector<8x128xf32>
      %56 = math.tanh %55 : vector<8x128xf32>
      %57 = arith.mulf %52, %56 : vector<8x128xf32>
      %58 = vector.broadcast %arg9 : i32 to vector<8x1xi32>
      %59 = arith.cmpi slt, %58, %1 : vector<8x1xi32>
      %60 = vector.shape_cast %59 : vector<8x1xi1> to vector<8x1xi1>
      %61 = vector.broadcast %60 : vector<8x1xi1> to vector<8x128xi1>
      %62 = arith.select %61, %57, %arg10 : vector<8x128xi1>, vector<8x128xf32>
      %63 = vector.shape_cast %59 : vector<8x1xi1> to vector<8x1xi1>
      %64 = vector.broadcast %63 : vector<8x1xi1> to vector<8x128xi1>
      %65 = arith.select %64, %55, %arg11 : vector<8x128xi1>, vector<8x128xf32>
      scf.yield %62, %65 : vector<8x128xf32>, vector<8x128xf32>
    }
    %c0_7 = arith.constant 0 : index
    %c0_8 = arith.constant 0 : index
    %9 = vector.load %arg6[%c0_7, %c0_8] : memref<128x128xf32, #tpu.memory_space<vmem>>, vector<128x128xf32>
    %cst_9 = arith.constant dense<0.000000e+00> : vector<8x128xf32>
    %10 = tpu.matmul %8#0, %9, %cst_9 {dimension_numbers = #tpu.dot_dimension_numbers<[1], [0], [0], [1], [0, 0, 1, 1], [], []>} : vector<8x128xf32>, vector<128x128xf32>, vector<8x128xf32> -> vector<8x128xf32>
    %c0_10 = arith.constant 0 : index
    %c0_11 = arith.constant 0 : index
    %11 = vector.load %arg7[%c0_10, %c0_11] : memref<1x128xf32, #tpu.memory_space<vmem>>, vector<1x128xf32>
    %12 = vector.broadcast %11 : vector<1x128xf32> to vector<8x128xf32>
    %13 = arith.addf %10, %12 : vector<8x128xf32>
    %cst_12 = arith.constant dense<0xFF800000> : vector<8xf32>
    %14 = vector.multi_reduction <maximumf>, %13, %cst_12 [1] : vector<8x128xf32> to vector<8xf32>
    %15 = vector.shape_cast %14 : vector<8xf32> to vector<8x1xf32>
    %16 = vector.broadcast %15 : vector<8x1xf32> to vector<8x128xf32>
    %17 = arith.subf %13, %16 : vector<8x128xf32>
    %18 = math.exp %17 : vector<8x128xf32>
    %cst_13 = arith.constant dense<0.000000e+00> : vector<8xf32>
    %19 = vector.multi_reduction <add>, %18, %cst_13 [1] : vector<8x128xf32> to vector<8xf32>
    %20 = vector.shape_cast %19 : vector<8xf32> to vector<8x1xf32>
    %21 = math.log %20 : vector<8x1xf32>
    %22 = vector.broadcast %21 : vector<8x1xf32> to vector<8x128xf32>
    %23 = arith.subf %17, %22 : vector<8x128xf32>
    %c0_14 = arith.constant 0 : index
    %c0_15 = arith.constant 0 : index
    %24 = vector.load %arg8[%c0_14, %c0_15] : memref<8x128xf32, #tpu.memory_space<vmem>>, vector<8x128xf32>
    tpu.vector_store %arg8[%c0_14, %c0_15], %23 {strides = array<i32>} : memref<8x128xf32, #tpu.memory_space<vmem>>, vector<8x128xf32>,
    return
  }
  func.func @transform_0(%arg0: i32, %arg1: memref<1xi32, #tpu.memory_space<smem>>) -> (i32, i32, i32) {
    %c0_i32 = arith.constant 0 : i32
    %c0_i32_0 = arith.constant 0 : i32
    %c0_i32_1 = arith.constant 0 : i32
    return %c0_i32, %arg0, %c0_i32_0 : i32, i32, i32
  }
  func.func @transform_1(%arg0: i32, %arg1: memref<1xi32, #tpu.memory_space<smem>>) -> (i32, i32) {
    %c0_i32 = arith.constant 0 : i32
    %c0_i32_0 = arith.constant 0 : i32
    return %arg0, %c0_i32 : i32, i32
  }
  func.func @transform_2(%arg0: i32, %arg1: memref<1xi32, #tpu.memory_space<smem>>) -> (i32, i32) {
    %c0_i32 = arith.constant 0 : i32
    %c0_i32_0 = arith.constant 0 : i32
    %c0_i32_1 = arith.constant 0 : i32
    return %c0_i32, %c0_i32_0 : i32, i32
  }
  func.func @transform_3(%arg0: i32, %arg1: memref<1xi32, #tpu.memory_space<smem>>) -> (i32, i32) {
    %c0_i32 = arith.constant 0 : i32
    %c0_i32_0 = arith.constant 0 : i32
    %c0_i32_1 = arith.constant 0 : i32
    return %c0_i32, %c0_i32_0 : i32, i32
  }
  func.func @transform_4(%arg0: i32, %arg1: memref<1xi32, #tpu.memory_space<smem>>) -> (i32, i32) {
    %c0_i32 = arith.constant 0 : i32
    %c0_i32_0 = arith.constant 0 : i32
    %c0_i32_1 = arith.constant 0 : i32
    return %c0_i32, %c0_i32_0 : i32, i32
  }
  func.func @transform_5(%arg0: i32, %arg1: memref<1xi32, #tpu.memory_space<smem>>) -> (i32, i32) {
    %c0_i32 = arith.constant 0 : i32
    %c0_i32_0 = arith.constant 0 : i32
    %c0_i32_1 = arith.constant 0 : i32
    return %c0_i32, %c0_i32_0 : i32, i32
  }
  func.func @transform_6(%arg0: i32, %arg1: memref<1xi32, #tpu.memory_space<smem>>) -> (i32, i32) {
    %c0_i32 = arith.constant 0 : i32
    %c0_i32_0 = arith.constant 0 : i32
    return %arg0, %c0_i32 : i32, i32
  }
}

</mosaic_0001>

<bundles_post_ra>
// kernel: tpu_custom_call.1
= control target key start
LH: loop header
LB: loop body
LE: loop exit
PB: predicated region body
PF: predicated region fallthrough
CT: control target
= control target key end

     0   :  { %s1840_s0 = inlined_call_operand.<no memory space> [shape: s32[1], index: 0, kind: input, shape index: {}]   ;;  %s1841_s1 = inlined_call_operand.hbm [shape: f32[16,16,512], index: 1, kind: input, shape index: {}]   ;;  %s1842_s2 = inlined_call_operand.vmem [shape: s32[16,1], index: 2, kind: input, shape index: {}]   ;;  %s1843_s3 = inlined_call_operand.hbm [shape: bf16[128,512], index: 3, kind: input, shape index: {}]   ;;  %s1844_s4 = inlined_call_operand.vmem [shape: f32[1,512], index: 4, kind: input, shape index: {}]   ;;  %s1845_s5 = inlined_call_operand.hbm [shape: f32[128,128], index: 5, kind: input, shape index: {}]   ;;  %s1846_s6 = inlined_call_operand.vmem [shape: f32[1,128], index: 6, kind: input, shape index: {}]   ;;  %s1847_s7 = inlined_call_operand.hbm [shape: f32[16,128], index: 7, kind: output, shape index: {}]  }
   0x1   :  { %1855 = sst [smem:[#allocation16_spill]] %s1843_s3 }
   0x2   :  { %12 = sst [smem:[#allocation3]] %s1840_s0 }
   0x3   :  { %13 = vsyncpa [#allocation5], 0 }
   0x4   :  { %15 = vsyncpa [#allocation5 + $0x1], 0 }
   0x5   :  { %16 = vsyncpa [#allocation8], 0 }
   0x6   :  { %17 = vsyncpa [#allocation6], 0 }
   0x7   :  { %19 = vsyncpa [#allocation6 + $0x1], 0  ;;  %s1420_s26 = smov 0   ;;  %s1422_s27 = smov 0  }
   0x8   :  { %s1424_s28 = smov 0   ;;  %s1426_s29 = smov 0  }
   0x9 LB: > { %s1441_s0 = sadd.s32 4294967295, %s1344_s29   ;;  %s906_s30 = sadd.s32 4294967294, %s1344_s29   ;;  %s1344_s29 = sphi %s1426_s29, %s1878_s29   ;;  %s1340_s28 = sphi %s1424_s28, %s1882_s28   ;;  %s1336_s27 = sphi %s1422_s27, %s1881_s27   ;;  %s1332_s26 = sphi %s1420_s26, %s1880_s26  }
   0xa   : > { %s1445_s8 = sadd.s32 1, %s1344_s29   ;;  %s32_s9 = sadd.s32 1, %s1340_s28 }
   0xb   : > { %1856 = sst [smem:[#allocation14_spill]] %s1445_s8  ;;  %s29_s10 = ssub.s32 %s1344_s29, %s1445_s8 }
   0xc   : > { %p39_p0 = scmp.ne.s32.totalorder %s1340_s28, %s1336_s27  ;;  %p30_p1 = scmp.eq.s32.totalorder %s29_s10, 0 }
   0xd   : > { %p40_p2 = scmp.eq.s32.totalorder %s1344_s29, 0  ;;  %p45_p3 = scmp.ne.s32.totalorder %s1336_s27, %s1332_s26 }
   0xe   : > { %p1848_p4 = scmp.eq.s32.totalorder %s1441_s0, 0  ;;  %p179_p7 = scmp.eq.s32.totalorder %s1441_s0, 1 }
   0xf   : > { %s1457_s11 = scalar_select %p30_p1, %s1340_s28, %s32_s9  }
  0x10   : > { %p1459_p5 = por %p40_p2, %p39_p0  ;;  %p1465_p6 = por %p1848_p4, %p45_p3 }
  0x11   : > { %1857 = sst [smem:[#allocation15_spill]] %s1457_s11  ;;  %p185_p8 = scmp.eq.s32.totalorder %s906_s30, 1 }
  0x12   : > { %s1858_s12 = scalar_select %p1459_p5, 1, 0 }
  0x13   : > { %s1859_s13 = scalar_select %p1465_p6, 1, 0 }
  0x14   : > { %p907_p9 = scmp.ge.s32.totalorder %s1344_s29, 1  ;;  %p192_p10 = scmp.lt.s32.totalorder %s1344_s29, 3 }
  0x15   : > { %p1472_p11 = por %p179_p7, %p39_p0  ;;  %p1476_p12 = por %p185_p8, %p45_p3 }
  0x16   : > { %p1480_p13 = pnand %p907_p9, %p192_p10  ;;  %s1362_s17 = smov [#allocation7]  }
  0x17   : > { %s1860_s14 = scalar_select %p1472_p11, 1, 0 }
  0x18   : > { %s1861_s15 = scalar_select %p1476_p12, 1, 0 }
  0x19   : > { %s1862_s16 = scalar_select %p1480_p13, 1, 0 }
  0x1a   : > { %p1053_p1 = pneg %p1480_p13  ;;  %s204_s18 = sshll.u32 %s1362_s17, 4  ;;  %s205_s18 = int_to_ptr.vmem [resolvable:$true] %s204_s18 }
  0x1b   : > { %s1363_s20 = smov [#allocation9]   ;;  %s1864_s3 = sld [smem:[#allocation16_spill]] }
  0x1c   : > { %p1488_p2 = pnand %p1053_p1, %p1848_p4  ;;  %s220_s21 = sshll.u32 %s1363_s20, 4  ;;  %s221_s21 = int_to_ptr.vmem [resolvable:$true] %s220_s21 }
  0x1e   : > { %p1174_p8 = pneg %p1488_p2 }
  0x21   : > { %s1172_s24 = scalar_lea.hbm %s1864_s3, 4096 }
  0x22   : > { %p1173_p7 = scmp.ne.s32.totalorder %s1864_s3, %s1172_s24  ;;  %p1179_p1 = scmp.lt.u32.totalorder %s1172_s24, %s1864_s3 }
  0x24   : > { %p1175_p9 = pnand %p1174_p8, %p1173_p7 }
  0x26   : > { %p1176_p10 = pneg %p1175_p9 }
  0x28   : > { %p1181_p0 = pnand %p1179_p1, %p1176_p10 }
  0x2a   : > { %1184 = shalt.err (!%p1181_p0)
}
  0x2b   : > { %s1185_s17 = scalar_lea.vmem %s205_s18, 4096  ;;  %p1193_p11 = scmp.lt.s32.totalorder %s205_s18, %s205_s18 }
  0x2c   : > { %p1186_p4 = scmp.ne.s32.totalorder %s205_s18, %s1185_s17  ;;  %p1194_p6 = scmp.lt.s32.totalorder %s1185_s17, %s1185_s17 }
  0x2e   : > { %p1188_p3 = pnand %p1186_p4, %p1174_p8  ;;  %p1195_p13 = por %p1194_p6, %p1193_p11 }
  0x30   : > { %p1189_p12 = pneg %p1188_p3 }
  0x32   : > { %p1196_p5 = pnand %p1195_p13, %p1189_p12 }
  0x34   : > { %1199 = shalt.err (!%p1196_p5)
}
  0x35   : > { %s1364_s20 = smov 256   ;;  %s1365_s22 = smov 16  }
  0x36   : > { %1056 = dma.hbm_to_vmem [thread:$0]  (!%p1488_p2), %s1864_s3, 4096, %s205_s18, [#allocation8], %s1364_s20, %s1364_s20, %s1365_s22  }
  0x37   : > { %p1865_p0 = scmp.ne.s32.totalorder %s1858_s12, 0  ;;  %p1866_p4 = scmp.lt.s32.totalorder %s1344_s29, 2 }
  0x38   : > { %s237_s30 = sand.u32 1, %s1340_s28   ;;  %s1200_s17 = scalar_lea.hbm %s1845_s5, 2048 }
  0x39   : > { %p1520_p3 = pnand %p1866_p4, %p1865_p0  ;;  %p1201_p5 = scmp.ne.s32.totalorder %s1845_s5, %s1200_s17 }
  0x3a   : > { %p1207_p12 = scmp.lt.u32.totalorder %s1200_s17, %s1845_s5 }
  0x3b   : > { %s1867_s25 = scalar_select %p1520_p3, 1, 0 }
  0x3c   : > { %p1203_p6 = pnand %p1201_p5, %p1174_p8 }
  0x3e   : > { %p1204_p11 = pneg %p1203_p6 }
  0x40   : > { %p1209_p13 = pnand %p1207_p12, %p1204_p11 }
  0x42   : > { %1212 = shalt.err (!%p1209_p13)
}
  0x43   : > { %s1213_s20 = scalar_lea.vmem %s221_s21, 2048  ;;  %p1221_p1 = scmp.lt.s32.totalorder %s221_s21, %s221_s21 }
  0x44   : > { %p1214_p7 = scmp.ne.s32.totalorder %s221_s21, %s1213_s20  ;;  %p1222_p0 = scmp.lt.s32.totalorder %s1213_s20, %s1213_s20 }
  0x46   : > { %p1216_p9 = pnand %p1214_p7, %p1174_p8  ;;  %p1223_p4 = por %p1222_p0, %p1221_p1 }
  0x48   : > { %p1217_p10 = pneg %p1216_p9 }
  0x4a   : > { %p1224_p3 = pnand %p1223_p4, %p1217_p10 }
  0x4c   : > { %1227 = shalt.err (!%p1224_p3)
}
  0x4d   : > { %s1366_s8 = smov 128   ;;  %s1367_s11 = smov 8  }
  0x4e   : > { %1059 = dma.hbm_to_vmem [thread:$0]  (!%p1488_p2), %s1845_s5, 2048, %s221_s21, [#allocation8], %s1366_s8, %s1366_s8, %s1367_s11  }
  0x4f   : > { %s911_s24 = sshll.u32 %s237_s30, 9  ;;  %s963_s9 = sshll.u32 %s1344_s29, 9 }
  0x50   : > { %s1549_s12 = scalar_lea.hbm %s1841_s1, %s963_s9  ;;  %s241_s18 = scalar_lea.vmem [#allocation4], %s911_s24 }
  0x51   : > { %s248_s20 = sshll.u32 %s241_s18, 4  ;;  %s1553_s19 = scalar_lea.sflag [#allocation5], %s237_s30  ;;  %s1551_s20 = int_to_ptr.vmem [resolvable:$true] %s248_s20 }
  0x52   : > { %s1228_s3 = scalar_lea.hbm %s1549_s12, 8192  ;;  %p1868_p2 = scmp.ne.s32.totalorder %s1867_s25, 0 }
  0x53   : > { %p1229_p8 = scmp.ne.s32.totalorder %s1549_s12, %s1228_s3  ;;  %s1233_s11 = scalar_lea.hbm %s1841_s1, 16384 }
  0x54   : > { %p1230_p3 = pneg %p1868_p2  ;;  %p1234_p11 = scmp.lt.u32.totalorder %s1549_s12, %s1841_s1 }
  0x55   : > { %p1235_p12 = scmp.lt.u32.totalorder %s1233_s11, %s1228_s3  ;;  %p1237_p7 = scmp.lt.u32.totalorder %s1228_s3, %s1549_s12 }
  0x56   : > { %p1231_p5 = pnand %p1230_p3, %p1229_p8 }
  0x57   : > { %p1236_p13 = por %p1235_p12, %p1234_p11 }
  0x58   : > { %p1232_p6 = pneg %p1231_p5 }
  0x59   : > { %p1238_p9 = por %p1237_p7, %p1236_p13 }
  0x5b   : > { %p1239_p10 = pnand %p1238_p9, %p1232_p6 }
  0x5d   : > { %1242 = shalt.err (!%p1239_p10)
}
  0x5e   : > { %s1243_s30 = scalar_lea.vmem %s1551_s20, 8192  ;;  %s1368_s24 = smov [#allocation4]  }
  0x5f   : > { %p1244_p1 = scmp.ne.s32.totalorder %s1551_s20, %s1243_s30  ;;  %s1248_s9 = sshll.u32 %s1368_s24, 4  ;;  %s1249_s9 = int_to_ptr.vmem [resolvable:$false] %s1248_s9 }
  0x60   : > { %s1250_s10 = scalar_lea.vmem %s1249_s9, 16384  ;;  %p1251_p8 = scmp.lt.s32.totalorder %s1551_s20, %s1249_s9 }
  0x61   : > { %p1246_p0 = pnand %p1244_p1, %p1230_p3  ;;  %p1252_p5 = scmp.lt.s32.totalorder %s1250_s10, %s1243_s30 }
  0x63   : > { %p1247_p4 = pneg %p1246_p0  ;;  %p1253_p11 = por %p1252_p5, %p1251_p8 }
  0x65   : > { %p1254_p12 = pnand %p1253_p11, %p1247_p4 }
  0x67   : > { %1257 = shalt.err (!%p1254_p12)
}
  0x68   : > { %s1369_s3 = smov 1024   ;;  %s1370_s17 = smov 512  }
  0x69   : > { %s1371_s18 = smov 32   ;;  %p1869_p3 = scmp.ne.s32.totalorder %s1862_s16, 0 }
  0x6a   : > { %1063 = dma.hbm_to_vmem [thread:$0]  (!%p1868_p2), %s1549_s12, 8192, %s1551_s20, %s1553_s19, %s1369_s3, %s1370_s17, %s1371_s18  }
  0x6b   : > { %267 = sbr.rel (%p1869_p3) target bundleno = 1006 (0x3ee), region = 44  ;;  %s1584_s21 = sand.u32 (!%p1869_p3), 1, %s1336_s27  }
  0x6c   : > { %s915_s8 = sshll.u32 (!%p1869_p3), %s1584_s21, 9  ;;  %s270_s11 = scalar_lea.sflag (!%p1869_p3), [#allocation5], %s1584_s21 }
  0x6d   : > { %s1588_s22 = scalar_lea.vmem (!%p1869_p3), [#allocation4], %s915_s8  ;;  %p1870_p6 = scmp.ne.s32.totalorder (!%p1869_p3), %s1859_s13, 0 }
  0x72   : > { %1319 = dma.done.wait (%p1870_p6), %s270_s11, 8192  }
  0x73   : > { %1321 = vsyncadd (%p1870_p6), %s270_s11, 4294959104  ;;  %p1871_p2 = scmp.eq.s32.totalorder %s1441_s0, 0 }
  0x75   : > { %1323 = dma.done.wait (%p1871_p2), [#allocation8], 6144   ;;  %p1872_p13 = pmov %p1871_p2 }
  0x76   : > { %p314_p7 = scmp.lt.s32.totalorder %s1441_s0, 1  ;;  %s918_s16 = sshll.u32 %s1584_s21, 3  ;;  %v1608_v1 = vld [vmem:[#allocation7] sm:$0xff]  ;;  %v1610_v2 = vld [vmem:[#allocation7 + $0x8] sm:$0xff]  ;;  %v1612_v3 = vld [vmem:[#allocation7 + $0x10] sm:$0xff]  ;;  %v1682_v34 = vmov 0.0  }
  0x77   : > { %1325 = vsyncadd (%p1872_p13), [#allocation8], 4294961152  ;;  %s1600_s25 = sld [smem:[#allocation3]]  ;;  %v1614_v4 = vld [vmem:[#allocation7 + $0x18] sm:$0xff]  ;;  %v1616_v5 = vld [vmem:[#allocation7 + $0x20] sm:$0xff]  ;;  %s1679_s9 = scalar_lea.vmem [#allocation10], %s918_s16 }
  0x78   : > { %s315_s12 = scalar_select %p314_p7, %s1441_s0, 1  ;;  %v1618_v6 = vld [vmem:[#allocation7 + $0x28] sm:$0xff]  ;;  %v1620_v7 = vld [vmem:[#allocation7 + $0x30] sm:$0xff]  ;;  %v1622_v8 = vld [vmem:[#allocation7 + $0x38] sm:$0xff] }
  0x79   : > { %v1624_v9 = vld [vmem:[#allocation7 + $0x40] sm:$0xff]  ;;  %v1626_v10 = vld [vmem:[#allocation7 + $0x48] sm:$0xff]  ;;  %v1628_v11 = vld [vmem:[#allocation7 + $0x50] sm:$0xff] }
  0x7a   : > { %s919_s20 = sshll.u32 %s315_s12, 3  ;;  %v1630_v12 = vld [vmem:[#allocation7 + $0x58] sm:$0xff]  ;;  %v1632_v13 = vld [vmem:[#allocation7 + $0x60] sm:$0xff]  ;;  %v1634_v14 = vld [vmem:[#allocation7 + $0x68] sm:$0xff] }
  0x7b   : > { %s317_s13 = scalar_lea.vmem %s1842_s2, %s919_s20  ;;  %v1636_v15 = vld [vmem:[#allocation7 + $0x70] sm:$0xff]  ;;  %v1638_v16 = vld [vmem:[#allocation7 + $0x78] sm:$0xff]  ;;  %v1640_v17 = vld [vmem:[#allocation7 + $0x80] sm:$0xff] }
  0x7c   : > { %v1606_v0 = vld [vmem:[%s317_s13] sm:$0xff]  ;;  %v1642_v18 = vld [vmem:[#allocation7 + $0x88] sm:$0xff]  ;;  %v1644_v19 = vld [vmem:[#allocation7 + $0x90] sm:$0xff] }
  0x7d   : > { %v1646_v20 = vld [vmem:[#allocation7 + $0x98] sm:$0xff]  ;;  %v1648_v21 = vld [vmem:[#allocation7 + $0xa0] sm:$0xff]  ;;  %v1650_v22 = vld [vmem:[#allocation7 + $0xa8] sm:$0xff]  ;;  %p920_p9 = scmp.le.s32.totalorder %s1600_s25, 0 }
  0x7e   : > { %v1652_v23 = vld [vmem:[#allocation7 + $0xb0] sm:$0xff]  ;;  %v1654_v24 = vld [vmem:[#allocation7 + $0xb8] sm:$0xff]  ;;  %v1656_v25 = vld [vmem:[#allocation7 + $0xc0] sm:$0xff]  ;;  %v1684_v35 = vmov (!%p920_p9), 0.0   ;;  %v1686_v36 = vmov (!%p920_p9), 0.0   ;;  %s1688_s10 = smov (!%p920_p9), 0  }
  0x7f   : > { %v1658_v26 = vld [vmem:[#allocation7 + $0xc8] sm:$0xff]  ;;  %v1660_v27 = vld [vmem:[#allocation7 + $0xd0] sm:$0xff]  ;;  %v1662_v28 = vld [vmem:[#allocation7 + $0xd8] sm:$0xff]  ;;  %851 = sbr.rel (%p920_p9) target bundleno = 430 (0x1ae), region = 102 }
  0x80   : > { %v1664_v29 = vld [vmem:[#allocation7 + $0xe0] sm:$0xff]  ;;  %v1666_v30 = vld [vmem:[#allocation7 + $0xe8] sm:$0xff]  ;;  %v1668_v31 = vld [vmem:[#allocation7 + $0xf0] sm:$0xff] }
  0x81   : > { %v1670_v32 = vld [vmem:[#allocation7 + $0xf8] sm:$0xff]  ;;  %v1675_v33 = vld [vmem:[%s1844_s4] sm:$0xf] }
  0x86 LB: >> { %v924_v37 = vcombine.high %v1608_v1, %v1612_v3  ;;  %v923_v38 = vcombine.low %v1608_v1, %v1612_v3  ;;  %v928_v39 = vcombine.high %v1616_v5, %v1620_v7  ;;  %v926_v40 = vcombine.high %v1610_v2, %v1614_v4  ;;  %s964_s3 = sshll.u32 %s1356_s10, 5  ;;  %s1356_s10 = sphi %s1688_s10, %s357_s10   ;;  %v1352_v36 = vphi %v1686_v36, %v1873_v36   ;;  %v1348_v35 = vphi %v1684_v35, %v673_v35  }
  0x87   : >> { %v925_v41 = vcombine.low %v1610_v2, %v1614_v4  ;;  %v930_v42 = vcombine.high %v1618_v6, %v1622_v8  ;;  %v927_v43 = vcombine.low %v1616_v5, %v1620_v7  ;;  %v932_v44 = vcombine.high %v1624_v9, %v1628_v11  ;;  %s364_s17 = scalar_lea.vmem %s1588_s22, %s964_s3 [#allocation4] }
  0x88   : >> { %530 = vmatprep.subr.bf16.mxu0 %v924_v37  ;;  %571 = vmatprep.subr.bf16.mxu1 %v926_v40  ;;  %v929_v45 = vcombine.low %v1618_v6, %v1622_v8  ;;  %v934_v46 = vcombine.high %v1626_v10, %v1630_v12  ;;  %v1372_v47 = vmov 0   ;;  %v931_v48 = vcombine.low %v1624_v9, %v1628_v11 }
  0x89   : >> { %531 = vmatpush1.bf16.msra.mxu0 %v923_v38  ;;  %572 = vmatpush1.bf16.msra.mxu1 %v925_v41  ;;  %v936_v49 = vcombine.high %v1632_v13, %v1636_v15  ;;  %v933_v50 = vcombine.low %v1626_v10, %v1630_v12  ;;  %v665_v51 = vstv %s1356_s10  ;;  %v938_v52 = vcombine.high %v1634_v14, %v1638_v16  ;;  %s357_s10 = sadd.s32 1, %s1356_s10  }
  0x8a   : >> { %532 = vmatprep.subr.bf16.mxu0 %v928_v39  ;;  %573 = vmatprep.subr.bf16.mxu1 %v930_v42  ;;  %vm666_vm0 = vcmp.lt.s32.totalorder %v665_v51, %v1606_v0  ;;  %v935_v54 = vcombine.low %v1632_v13, %v1636_v15  ;;  %v940_v55 = vcombine.high %v1640_v17, %v1644_v19  ;;  %v366_v51 = vld [vmem:[%s364_s17 + $0x8] sm:$0xff]  ;;  %p356_p10 = scmp.ge.s32.totalorder %s357_s10, %s1600_s25 }
  0x8b   : >> { %562 = vmatprep.mubr.bf16.mxu0 %v1372_v47  ;;  %603 = vmatprep.mubr.bf16.mxu1 %v1372_v47  ;;  %v667_v53 = vsel %vm666_vm0, 1, %v1372_v47  ;;  %v937_v56 = vcombine.low %v1634_v14, %v1638_v16  ;;  %v942_v57 = vcombine.high %v1642_v18, %v1646_v20  ;;  %v939_v58 = vcombine.low %v1640_v17, %v1644_v19 }
  0x8c   : >> { %1151 = vset.pattern.permute.xlu0 %v1372_v47  ;;  %v944_v59 = vcombine.high %v1648_v21, %v1652_v23  ;;  %v941_v60 = vcombine.low %v1642_v18, %v1646_v20  ;;  %v946_v61 = vcombine.high %v1650_v22, %v1654_v24  ;;  %v943_v62 = vcombine.low %v1648_v21, %v1652_v23 }
  0x8d   : >> { %533 = vmatpush1.bf16.msra.mxu0 %v927_v43  ;;  %574 = vmatpush1.bf16.msra.mxu1 %v929_v45  ;;  %v948_v63 = vcombine.high %v1656_v25, %v1660_v27  ;;  %v945_v34 = vcombine.low %v1650_v22, %v1654_v24  ;;  %v950_v37 = vcombine.high %v1658_v26, %v1662_v28  ;;  %v617_v45 = vlaneseq }
  0x8e   : >> { %534 = vmatprep.subr.bf16.mxu0 %v932_v44  ;;  %575 = vmatprep.subr.bf16.mxu1 %v934_v46  ;;  %v947_v38 = vcombine.low %v1656_v25, %v1660_v27  ;;  %v952_v39 = vcombine.high %v1664_v29, %v1668_v31  ;;  %v949_v40 = vcombine.low %v1658_v26, %v1662_v28 }
  0x8f   : >> { %669 = vperm.xlu0 %1151, %v667_v53   ;;  %v954_v41 = vcombine.high %v1666_v30, %v1670_v32  ;;  %v951_v42 = vcombine.low %v1664_v29, %v1668_v31  ;;  %v953_v43 = vcombine.low %v1666_v30, %v1670_v32  ;;  %v369_v44 = vpack.c.bf16 %v1352_v36, %v1352_v36 }
  0x90   : >> { %v618_v46 = vshrl.u32 %v617_v45, 7 }
  0x91   : >> { %535 = vmatpush1.bf16.msra.mxu0 %v931_v48  ;;  %576 = vmatpush1.bf16.msra.mxu1 %v933_v50 }
  0x92   : >> { %536 = vmatprep.subr.bf16.mxu0 %v936_v49  ;;  %577 = vmatprep.subr.bf16.mxu1 %v938_v52  ;;  %v619_v47 = vsub.s32 0, %v618_v46  ;;  %v623_v48 = vsub.s32 1, %v618_v46  ;;  %v365_v49 = vld [vmem:[%s364_s17] sm:$0xff]  ;;  %v367_v52 = vld [vmem:[%s364_s17 + $0x10] sm:$0xff]  ;;  %v627_v45 = vsub.s32 2, %v618_v46 }
  0x94   : >> { %v620_v50 = vrot.slane %v1675_v33, %v619_v47 }
  0x95   : >> { %537 = vmatpush1.bf16.msra.mxu0 %v935_v54  ;;  %578 = vmatpush1.bf16.msra.mxu1 %v937_v56  ;;  %v624_v54 = vrot.slane %v1675_v33, %v623_v48  ;;  %v628_v48 = vrot.slane %v1675_v33, %v627_v45 }
  0x96   : >> { %538 = vmatprep.subr.bf16.mxu0 %v940_v55  ;;  %579 = vmatprep.subr.bf16.mxu1 %v942_v57  ;;  %v368_v55 = vld [vmem:[%s364_s17 + $0x18] sm:$0xff] }
  0x99   : >> { %539 = vmatpush1.bf16.msra.mxu0 %v939_v58  ;;  %580 = vmatpush1.bf16.msra.mxu1 %v941_v60 }
  0x9a   : >> { %540 = vmatprep.subr.bf16.mxu0 %v944_v59  ;;  %581 = vmatprep.subr.bf16.mxu1 %v946_v61  ;;  %v631_v59 = vsub.s32 3, %v618_v46 }
  0x9d   : >> { %541 = vmatpush1.bf16.msra.mxu0 %v943_v62  ;;  %582 = vmatpush1.bf16.msra.mxu1 %v945_v34 }
  0x9e   : >> { %542 = vmatprep.subr.bf16.mxu0 %v948_v63  ;;  %583 = vmatprep.subr.bf16.mxu1 %v950_v37 }
  0xa1   : >> { %543 = vmatpush1.bf16.msra.mxu0 %v947_v38  ;;  %584 = vmatpush1.bf16.msra.mxu1 %v949_v40 }
  0xa2   : >> { %544 = vmatprep.subr.bf16.mxu0 %v952_v39  ;;  %585 = vmatprep.subr.bf16.mxu1 %v954_v41 }
  0xa5   : >> { %545 = vmatpush1.bf16.msra.mxu0 %v951_v42  ;;  %586 = vmatpush1.bf16.msra.mxu1 %v953_v43  ;;  %v632_v43 = vrot.slane %v1675_v33, %v631_v59 }
  0xa8   : >> { %563 = vmatmul.mubr.bf16.vlgmr.msra.gmra.mrb[0].mxu0 %v369_v44  ;;  %604 = vmatmul.mubr.bf16.vlgmr.msra.gmra.mrb[0].mxu1 %v369_v44 }
 0x10e   : >> { %v670_v46 = vpop.permute.xlu0 %669 }
 0x10f   : >> { %vm671_vm1 = vcmp.eq.s32.totalorder %v670_v46, 1 }
 0x17b   : >> { %v564_v53 = vpop.f32.mrb[0].mxu0  ;;  %v605_v58 = vpop.f32.mrb[0].mxu1 }
 0x17c   : >> { %v612_v56 = vadd.f32 %v564_v53, %v365_v49  ;;  %v566_v57 = vpop.f32.mrb[1].mxu0  ;;  %v614_v62 = vadd.f32 %v605_v58, %v367_v52  ;;  %v607_v63 = vpop.f32.mrb[1].mxu1 }
 0x17d   : >> { %v613_v60 = vadd.f32 %v566_v57, %v366_v51  ;;  %v568_v61 = vpop.f32.mrb[2].mxu0  ;;  %v615_v38 = vadd.f32 %v607_v63, %v368_v55  ;;  %v609_v39 = vpop.f32.mrb[2].mxu1 }
 0x17e   : >> { %v637_v34 = vadd.f32 %v620_v50, %v612_v56  ;;  %v569_v37 = vpop.f32.mrb[3].mxu0  ;;  %v610_v41 = vpop.f32.mrb[3].mxu1  ;;  %v639_v51 = vadd.f32 %v628_v48, %v614_v62 }
 0x17f   : >> { %v638_v40 = vadd.f32 %v624_v54, %v613_v60  ;;  %v640_v47 = vadd.f32 %v632_v43, %v615_v38 }
 0x180   : >> { %v955_v42 = vmul.f32 -1.442695, %v637_v34 }
 0x181   : >> { %v956_v44 = vmul.f32 -1.442695, %v638_v40  ;;  %v957_v49 = vmul.f32 -1.442695, %v640_v47 }
 0x182   : >> { %1152 = vpow2.f32 %v955_v42 }
 0x183   : >> { %1154 = vpow2.f32 %v956_v44 }
 0x184   : >> { %1156 = vpow2.f32 %v957_v49 }
 0x185   : >> { %1158 = vtanh.f32 %v639_v51 }
 0x18c   : >> { %v1153_v52 = vpop.eup %1152 }
 0x18d   : >> { %v1155_v50 = vpop.eup %1154  ;;  %v644_v53 = vadd.f32 1.0, %v1153_v52 }
 0x18e   : >> { %v650_v55 = vadd.f32 1.0, %v1155_v50  ;;  %v1157_v54 = vpop.eup %1156 }
 0x18f   : >> { %1160 = vrcp.f32 %v644_v53  ;;  %v1159_v56 = vpop.eup %1158  ;;  %v657_v58 = vadd.f32 1.0, %v1157_v54 }
 0x190   : >> { %1162 = vrcp.f32 %v650_v55 }
 0x191   : >> { %1164 = vrcp.f32 %v657_v58 }
 0x199   : >> { %v1161_v57 = vpop.eup %1160 }
 0x19a   : >> { %v1163_v59 = vpop.eup %1162  ;;  %v661_v60 = vmul.f32 %v1161_v57, %v1159_v56 }
 0x19b   : >> { %v660_v61 = vmul.f32 %v1348_v35, %v1163_v59  ;;  %v1165_v63 = vpop.eup %1164 }
 0x19d   : >> { %v662_v62 = vadd.f32 %v661_v60, %v660_v61 }
 0x19f   : >> { %1166 = vtanh.f32 %v662_v62  ;;  %v673_v35 = vsel %vm671_vm1, %v662_v62, %v1348_v35  }
 0x1a7   : > { %359 = sbr.rel (!%p356_p10) target bundleno = 134 (0x86), region = 108 }
 0x1a9   : >> { %v1167_v34 = vpop.eup %1166 }
 0x1aa   : >> { %v664_v37 = vmul.f32 %v1167_v34, %v1165_v63 }
 0x1ac   : >> { %v672_v38 = vsel %vm671_vm1, %v664_v37, %v1352_v36  }
 0x1ad   : >> { %v1873_v36 = vmov %v672_v38  ;;  %v1874_v34 = vmov (%p356_p10), %v672_v38 }
 0x1ae PF: > { %v674_v39 = vld [vmem:[#allocation9] sm:$0xff]  ;;  %v675_v40 = vld [vmem:[#allocation9 + $0x8] sm:$0xff]  ;;  %v676_v36 = vld [vmem:[#allocation9 + $0x10] sm:$0xff]  ;;  %v1373_v41 = vmov 0.0|0.0   ;;  %vm1374_vm2 = vmmov 0   ;;  %v1375_v44 = vmov 0.0   ;;  %v1360_v34 = vphi %v1682_v34, %v1874_v34  }
 0x1af   : > { %1017 = vmatprep.subr.bf16.mxu0 %v1373_v41  ;;  %v1018_v42 = vpack.c.bf16 %v675_v40, %v674_v39  ;;  %v677_v43 = vld [vmem:[#allocation9 + $0x18] sm:$0xff]  ;;  %1014 = vmatprep.mubr.msk.f32.mxu0 %vm1374_vm2, %v1375_v44  ;;  %v678_v47 = vld [vmem:[#allocation9 + $0x20] sm:$0xff]  ;;  %v679_v0 = vld [vmem:[#allocation9 + $0x28] sm:$0xff]  ;;  %s960_s11 = sshll.u32 %s1441_s0, 7  ;;  %s792_s22 = sshll.u32 %s1679_s9, 4  ;;  %s1797_s22 = int_to_ptr.vmem [resolvable:$true] %s792_s22 }
 0x1b0   : > { %v1021_v45 = vpack.c.bf16 %v677_v43, %v676_v36  ;;  %v1024_v1 = vpack.c.bf16 %v679_v0, %v678_v47  ;;  %v680_v2 = vld [vmem:[#allocation9 + $0x30] sm:$0xff]  ;;  %v681_v3 = vld [vmem:[#allocation9 + $0x38] sm:$0xff]  ;;  %v682_v5 = vld [vmem:[#allocation9 + $0x40] sm:$0xff]  ;;  %s1795_s12 = scalar_lea.hbm %s1847_s7, %s960_s11  ;;  %s779_s20 = scalar_lea.sflag [#allocation6], %s1584_s21 }
 0x1b1   : > { %1019 = vmatpush3.bf16.msra.mxu0 %v1018_v42  ;;  %v1027_v4 = vpack.c.bf16 %v681_v3, %v680_v2  ;;  %v683_v6 = vld [vmem:[#allocation9 + $0x48] sm:$0xff]  ;;  %v684_v8 = vld [vmem:[#allocation9 + $0x50] sm:$0xff]  ;;  %v685_v9 = vld [vmem:[#allocation9 + $0x58] sm:$0xff]  ;;  %s1258_s19 = scalar_lea.vmem %s1797_s22, 128  ;;  %p1875_p0 = scmp.ne.s32.totalorder %s1860_s14, 0 }
 0x1b2   : > { %1020 = vmatprep.subr.bf16.mxu0 %v1373_v41  ;;  %v1030_v7 = vpack.c.bf16 %v683_v6, %v682_v5  ;;  %v1033_v10 = vpack.c.bf16 %v685_v9, %v684_v8  ;;  %v686_v11 = vld [vmem:[#allocation9 + $0x60] sm:$0xff]  ;;  %v687_v12 = vld [vmem:[#allocation9 + $0x68] sm:$0xff]  ;;  %v688_v14 = vld [vmem:[#allocation9 + $0x70] sm:$0xff]  ;;  %p1259_p1 = scmp.ne.s32.totalorder %s1797_s22, %s1258_s19  ;;  %s1376_s0 = smov [#allocation10]  }
 0x1b3   : > { %v1036_v13 = vpack.c.bf16 %v687_v12, %v686_v11  ;;  %v689_v15 = vld [vmem:[#allocation9 + $0x78] sm:$0xff]  ;;  %v958_v17 = vld [vmem:[%s1846_s6] ss:$0 sm:$0xff]  ;;  %s1262_s23 = sshll.u32 %s1376_s0, 4  ;;  %s1263_s23 = int_to_ptr.vmem [resolvable:$false] %s1262_s23 }
 0x1b4   : > { %v1039_v16 = vpack.c.bf16 %v689_v15, %v688_v14  ;;  %p1260_p4 = pnand %p1259_p1, %p1875_p0  ;;  %s1264_s13 = scalar_lea.vmem %s1263_s23, 256 }
 0x1b5   : > { %1022 = vmatpush3.bf16.msra.mxu0 %v1021_v45  ;;  %p1265_p5 = scmp.lt.s32.totalorder %s1797_s22, %s1263_s23  ;;  %p1266_p11 = scmp.lt.s32.totalorder %s1264_s13, %s1258_s19 }
 0x1b6   : > { %1023 = vmatprep.subr.bf16.mxu0 %v1373_v41  ;;  %p1261_p8 = pneg %p1260_p4 }
 0x1b7   : > { %p1267_p12 = por %p1266_p11, %p1265_p5 }
 0x1b9   : > { %1025 = vmatpush3.bf16.msra.mxu0 %v1024_v1  ;;  %p1268_p3 = pnand %p1267_p12, %p1261_p8 }
 0x1ba   : > { %1026 = vmatprep.subr.bf16.mxu0 %v1373_v41 }
 0x1bd   : > { %1028 = vmatpush3.bf16.msra.mxu0 %v1027_v4 }
 0x1be   : > { %1029 = vmatprep.subr.bf16.mxu0 %v1373_v41 }
 0x1c1   : > { %1031 = vmatpush3.bf16.msra.mxu0 %v1030_v7 }
 0x1c2   : > { %1032 = vmatprep.subr.bf16.mxu0 %v1373_v41 }
 0x1c5   : > { %1034 = vmatpush3.bf16.msra.mxu0 %v1033_v10 }
 0x1c6   : > { %1035 = vmatprep.subr.bf16.mxu0 %v1373_v41 }
 0x1c9   : > { %1037 = vmatpush3.bf16.msra.mxu0 %v1036_v13 }
 0x1ca   : > { %1038 = vmatprep.subr.bf16.mxu0 %v1373_v41 }
 0x1cd   : > { %1040 = vmatpush3.bf16.msra.mxu0 %v1039_v16 }
 0x1d0   : > { %1015 = vmatmul.mubr.f32.vlgmr.msra.gmra.mrb[0].mxu0 %v1360_v34 }
 0x2a3   : > { %v763_v18 = vpop.f32.mrb[0].mxu0 }
 0x2a4   : > { %v764_v19 = vadd.f32 %v958_v17, %v763_v18  ;;  %v1016_v20 = vpop.f32.mrb[1].mxu0 }
 0x2a6   : > { %767 = vmax.xlane.f32.xlu0 %v764_v19 }
 0x333   : > { %v768_v21 = vpop.xlane.xlu0 %767 }
 0x334   : > { %v769_v22 = vsub.f32 %v764_v19, %v768_v21 }
 0x336   : > { %v770_v23 = vmul.f32 1.442695, %v769_v22 }
 0x338   : > { %1168 = vpow2.f32 %v770_v23 }
 0x342   : > { %v1169_v24 = vpop.eup %1168 }
 0x343   : > { %772 = vadd.xlane.f32.xlu0 %v1169_v24 }
 0x3d0   : > { %v773_v25 = vpop.xlane.xlu0 %772 }
 0x3d1   : > { %1170 = vlog2.f32 %v773_v25 }
 0x3db   : > { %v1171_v26 = vpop.eup %1170 }
 0x3dc   : > { %v775_v27 = vmul.f32 0.6931472, %v1171_v26 }
 0x3de   : > { %v776_v28 = vsub.f32 %v769_v22, %v775_v27 }
 0x3e0   : > { %777 = vst [vmem:[%s1679_s9] sm:$0xff] %v776_v28 }
 0x3e1   : > { %1271 = shalt.err (!%p1268_p3)
}
 0x3e2   : > { %s1272_s21 = scalar_lea.hbm %s1795_s12, 128  ;;  %s1276_s9 = scalar_lea.hbm %s1847_s7, 256 }
 0x3e3   : > { %p1273_p6 = scmp.ne.s32.totalorder %s1795_s12, %s1272_s21  ;;  %p1277_p7 = scmp.lt.u32.totalorder %s1795_s12, %s1847_s7 }
 0x3e4   : > { %p1278_p9 = scmp.lt.u32.totalorder %s1276_s9, %s1272_s21  ;;  %p1280_p1 = scmp.lt.u32.totalorder %s1272_s21, %s1795_s12 }
 0x3e5   : > { %p1274_p2 = pnand %p1273_p6, %p1875_p0 }
 0x3e6   : > { %p1279_p10 = por %p1278_p9, %p1277_p7 }
 0x3e7   : > { %p1275_p13 = pneg %p1274_p2 }
 0x3e8   : > { %p1281_p4 = por %p1280_p1, %p1279_p10 }
 0x3ea   : > { %p1282_p8 = pnand %p1281_p4, %p1275_p13 }
 0x3ec   : > { %1285 = shalt.err (!%p1282_p8)
}
 0x3ed   : > { %1051 = dma.vmem_to_hbm [thread:$0]  (%p1875_p0), %s1797_s22, 128, %s1795_s12, %s779_s20  }
 0x3ee PF: > { %s804_s17 = sand.u32 1, %s1332_s26   ;;  %p1876_p5 = scmp.ne.s32.totalorder %s1861_s15, 0 }
 0x3ef   : > { %p1877_p11 = scmp.ge.s32.totalorder %s1344_s29, 2  ;;  %s805_s18 = scalar_lea.sflag [#allocation6], %s804_s17 }
 0x3f1   : > { %p1065_p12 = pnand %p1877_p11, %p1876_p5 }
 0x3f3   : > { %1327 = dma.done.wait (!%p1065_p12), %s805_s18, 128  }
 0x3f4   : > { %1329 = vsyncadd (!%p1065_p12), %s805_s18, 4294967168  ;;  %s1878_s29 = sld [smem:[#allocation14_spill]]  ;;  %s1879_s8 = sld [smem:[#allocation15_spill]] }
 0x3f5   : > { %s1880_s26 = smov %s1336_s27  ;;  %s1881_s27 = smov %s1340_s28 }
 0x3fa   : > { %p22_p3 = scmp.ge.s32.totalorder %s1878_s29, 4   ;;  %s1882_s28 = smov %s1879_s8 }
 0x3fc   :  { %24 = sbr.rel (!%p22_p3) target bundleno = 9 (0x9), region = 119 }
 0x403   :  { %810 = vsyncpa [#allocation5], 1 }
 0x404   :  { %812 = vsyncpa [#allocation5 + $0x1], 1 }
 0x405   :  { %813 = vsyncpa [#allocation8], 1 }
 0x406   :  { %814 = vsyncpa [#allocation6], 1 }
 0x407   :  { %816 = vsyncpa [#allocation6 + $0x1], 1 }

</bundles_post_ra>
